<compile_context>
chip_gen: v7x
topology: tpu7x:2x2x1
jax: 0.10.0
libtpu: 0.0.40
codegen_flags: <defaults>
</compile_context>

<pallas_src>
import functools

import jax
import jax.numpy as jnp
from jax import lax
from jax.experimental import pallas as pl
from jax.experimental.pallas import tpu as pltpu

_LANE = 128


def _vmem_capacity_bytes():
    """Physical per-core VMEM; conservative 64 MiB fallback (fits every generation)."""
    try:
        return int(pltpu.get_tpu_info().vmem_capacity_bytes)
    except Exception:  # pragma: no cover - info query unavailable
        return 64 << 20


def _normalize(x_ref, o_ref, *, eps, n_valid, n_pad, w=None, b=None):
    # x_ref/o_ref: (TB, rows, 128) lane-dense.  Stats are per batch item.
    x = x_ref[...].astype(jnp.float32)
    inv_n = 1.0 / n_valid
    mean = jnp.sum(x, axis=(1, 2), keepdims=True) * inv_n        # (TB, 1, 1)
    d = x - mean                                                  # centered
    ss = jnp.sum(d * d, axis=(1, 2), keepdims=True)
    if n_pad:
        # Zero-padded tail elements contribute exactly mean^2 each; remove them.
        ss = ss - n_pad * (mean * mean)
    var = jnp.maximum(ss * inv_n, 0.0)                            # biased variance
    inv = lax.rsqrt(var + eps)
    y = d * inv
    if w is not None:
        y = y * w[None] + b[None]
    o_ref[...] = y.astype(o_ref.dtype)


def _ln_affine_kernel(x_ref, w_ref, b_ref, o_ref, *, eps, n_valid, n_pad):
    _normalize(x_ref, o_ref, eps=eps, n_valid=n_valid, n_pad=n_pad,
               w=w_ref[...], b=b_ref[...])


def _ln_kernel(x_ref, o_ref, *, eps, n_valid, n_pad):
    _normalize(x_ref, o_ref, eps=eps, n_valid=n_valid, n_pad=n_pad)


def layer_norm_pallas(x, weight=None, bias=None, idx=None, eps=1e-5):
    """x: (B, C, N, T); weight/bias: (C, num_nodes, T) or None; idx: (N,) node ids."""
    B, C, N, T = x.shape
    M = C * N * T
    Mp = ((M + _LANE - 1) // _LANE) * _LANE       # pad only to a lane multiple
    rows = Mp // _LANE
    n_pad = Mp - M
    affine = weight is not None

    xf = x.reshape(B, M)
    if n_pad:
        # TODO(synk): handle the ragged tail inside the kernel (masked tail /
        # manual DMA) to also remove this round trip when M % 128 != 0.
        xf = jnp.pad(xf, ((0, 0), (0, n_pad)))
    x3 = xf.reshape(B, rows, _LANE)               # lane-dense: last dim = 128 lanes

    if affine:
        # Parameter gather along the node axis is glue (plain JAX); keep f32.
        w_sel = weight[:, idx, :].reshape(M).astype(jnp.float32)
        b_sel = bias[:, idx, :].reshape(M).astype(jnp.float32)
        if n_pad:
            w_sel = jnp.pad(w_sel, (0, n_pad))
            b_sel = jnp.pad(b_sel, (0, n_pad))
        w3 = w_sel.reshape(rows, _LANE)
        b3 = b_sel.reshape(rows, _LANE)

    # ---- generation-aware block sizing -------------------------------------
    itemsize = jnp.dtype(x.dtype).itemsize
    cap = _vmem_capacity_bytes()
    vmem_ceiling = cap - (4 << 20)                 # leave headroom below physical
    two_core_part = cap <= (64 << 20)              # v7x proxy: 64 MiB VMEM, 2 TCs
    target_block = (12 << 20) if two_core_part else (24 << 20)
    # Per batch item: double-buffered in + out blocks (x dtype) plus ~2 f32
    # intermediates (upcast / centered block) Mosaic may materialize.
    per_item = Mp * (4 * itemsize + 8)
    # 2 params, f32, double-buffered by the default pipeline (accounted, not Buffered(1)).
    params_bytes = (4 * Mp * 4) if affine else 0

    tb_by_target = max(1, target_block // (Mp * itemsize))
    tb_by_vmem = max(1, (vmem_ceiling - params_bytes - (4 << 20)) // per_item)
    TB = int(max(1, min(B, tb_by_target, tb_by_vmem)))

    # Even step count on 2-TensorCore parts (only if it costs <= 2x block size).
    if two_core_part and B >= 2:
        for cand in range(TB, max(1, TB // 2) - 1, -1):
            if (-(-B // cand)) % 2 == 0:
                TB = cand
                break
    grid_len = -(-B // TB)

    vmem_needed = TB * per_item + params_bytes + (4 << 20)
    vmem_limit = int(min(max(vmem_needed, 32 << 20), vmem_ceiling))
    # -------------------------------------------------------------------------

    block = (TB, rows, _LANE)
    x_spec = pl.BlockSpec(block, lambda g: (g, 0, 0))
    out_spec = pl.BlockSpec(block, lambda g: (g, 0, 0))
    cparams = pltpu.CompilerParams(
        dimension_semantics=("parallel",), vmem_limit_bytes=vmem_limit)
    out_shape = jax.ShapeDtypeStruct((B, rows, _LANE), x.dtype)

    if affine:
        p_spec = pl.BlockSpec((rows, _LANE), lambda g: (0, 0))
        out = pl.pallas_call(
            functools.partial(_ln_affine_kernel, eps=eps,
                              n_valid=float(M), n_pad=float(n_pad)),
            out_shape=out_shape,
            grid=(grid_len,),
            in_specs=[x_spec, p_spec, p_spec],
            out_specs=out_spec,
            compiler_params=cparams,
        )(x3, w3, b3)
    else:
        out = pl.pallas_call(
            functools.partial(_ln_kernel, eps=eps,
                              n_valid=float(M), n_pad=float(n_pad)),
            out_shape=out_shape,
            grid=(grid_len,),
            in_specs=[x_spec],
            out_specs=out_spec,
            compiler_params=cparams,
        )(x3)

    if n_pad:
        return out.reshape(B, Mp)[:, :M].reshape(B, C, N, T)
    return out.reshape(B, C, N, T)


def layer_norm_ref(x, weight=None, bias=None, idx=None, eps=1e-5):
    """Pure-JAX reference mirroring F.layer_norm over dims 1:."""
    B = x.shape[0]
    xf = x.reshape(B, -1).astype(jnp.float32)
    mean = xf.mean(axis=1, keepdims=True)
    var = ((xf - mean) ** 2).mean(axis=1, keepdims=True)
    y = ((xf - mean) * lax.rsqrt(var + eps)).reshape(x.shape)
    if weight is not None:
        w = weight[:, idx, :][None].astype(jnp.float32)
        b = bias[:, idx, :][None].astype(jnp.float32)
        y = y * w + b
    return y.astype(x.dtype)


if __name__ == "__main__":
    # Small shapes consistent with the module: input (B, C, N, T),
    # normalized_shape = (C, num_nodes, T), idx selects N of num_nodes nodes.
    B, C, num_nodes, N, T = 2, 4, 10, 8, 16
    eps = 1e-5

    key = jax.random.PRNGKey(0)
    x = jax.random.normal(key, (B, C, N, T), dtype=jnp.float32)

    # Deterministic parameter init per LayerNorm.reset_parameters():
    weight = jnp.ones((C, num_nodes, T), dtype=jnp.float32)
    bias = jnp.zeros((C, num_nodes, T), dtype=jnp.float32)
    idx = jnp.arange(N, dtype=jnp.int32)

    # elementwise_affine=True path.
    out = jax.block_until_ready(layer_norm_pallas(x, weight, bias, idx, eps=eps))
    ref = layer_norm_ref(x, weight, bias, idx, eps=eps)
    assert out.shape == x.shape and out.dtype == x.dtype
    assert jnp.allclose(out, ref, atol=2e-5, rtol=1e-5), "affine mismatch vs reference"

    # Fast path matching DILEncoder's actual config (elementwise_affine=False).
    out2 = jax.block_until_ready(layer_norm_pallas(x, eps=eps))
    ref2 = layer_norm_ref(x, eps=eps)
    assert out2.shape == x.shape and out2.dtype == x.dtype
    assert jnp.allclose(out2, ref2, atol=2e-5, rtol=1e-5), "no-affine mismatch vs reference"

    print("KERNEL_OK")
</pallas_src>

<mosaic_0001>
module attributes {stable_mosaic.version = 11 : i64} {
  func.func @_ln_affine_kernel(%arg0: i32, %arg1: memref<1x4x128xf32, #tpu.memory_space<vmem>>, %arg2: memref<4x128xf32, #tpu.memory_space<vmem>>, %arg3: memref<4x128xf32, #tpu.memory_space<vmem>>, %arg4: memref<1x4x128xf32, #tpu.memory_space<vmem>>) attributes {dimension_semantics = [#tpu.dimension_semantics<parallel>], iteration_bounds = array<i64: 2>, scalar_prefetch = 0 : i64, scratch_operands = 0 : i64, tpu.core_type = #tpu.core_type<tc>, window_params = [{transform_indices = @transform_0, window_bounds = array<i64: 1, 4, 128>}, {pipeline_mode = #tpu.pipeline_mode<synchronous>, transform_indices = @transform_1, window_bounds = array<i64: 4, 128>}, {pipeline_mode = #tpu.pipeline_mode<synchronous>, transform_indices = @transform_2, window_bounds = array<i64: 4, 128>}, {transform_indices = @transform_3, window_bounds = array<i64: 1, 4, 128>}]} {
    %c0 = arith.constant 0 : index
    %c0_0 = arith.constant 0 : index
    %0 = vector.load %arg2[%c0, %c0_0] : memref<4x128xf32, #tpu.memory_space<vmem>>, vector<4x128xf32>
    %c0_1 = arith.constant 0 : index
    %c0_2 = arith.constant 0 : index
    %1 = vector.load %arg3[%c0_1, %c0_2] : memref<4x128xf32, #tpu.memory_space<vmem>>, vector<4x128xf32>
    %c0_3 = arith.constant 0 : index
    %c0_4 = arith.constant 0 : index
    %c0_5 = arith.constant 0 : index
    %2 = vector.load %arg1[%c0_3, %c0_4, %c0_5] : memref<1x4x128xf32, #tpu.memory_space<vmem>>, vector<1x4x128xf32>
    %cst = arith.constant dense<0.000000e+00> : vector<1xf32>
    %3 = vector.multi_reduction <add>, %2, %cst [1, 2] : vector<1x4x128xf32> to vector<1xf32>
    %4 = vector.shape_cast %3 : vector<1xf32> to vector<1x1x1xf32>
    %cst_6 = arith.constant 0.001953125 : f32
    %5 = vector.broadcast %cst_6 : f32 to vector<1x1x1xf32>
    %6 = arith.mulf %4, %5 : vector<1x1x1xf32>
    %7 = vector.broadcast %6 : vector<1x1x1xf32> to vector<1x4x128xf32>
    %8 = arith.subf %2, %7 : vector<1x4x128xf32>
    %9 = arith.mulf %8, %8 : vector<1x4x128xf32>
    %cst_7 = arith.constant dense<0.000000e+00> : vector<1xf32>
    %10 = vector.multi_reduction <add>, %9, %cst_7 [1, 2] : vector<1x4x128xf32> to vector<1xf32>
    %11 = vector.shape_cast %10 : vector<1xf32> to vector<1x1x1xf32>
    %cst_8 = arith.constant 0.001953125 : f32
    %12 = vector.broadcast %cst_8 : f32 to vector<1x1x1xf32>
    %13 = arith.mulf %11, %12 : vector<1x1x1xf32>
    %cst_9 = arith.constant 0.000000e+00 : f32
    %14 = vector.broadcast %cst_9 : f32 to vector<1x1x1xf32>
    %15 = arith.maximumf %13, %14 : vector<1x1x1xf32>
    %cst_10 = arith.constant 9.99999974E-6 : f32
    %16 = vector.broadcast %cst_10 : f32 to vector<1x1x1xf32>
    %17 = arith.addf %15, %16 : vector<1x1x1xf32>
    %18 = math.rsqrt %17 : vector<1x1x1xf32>
    %19 = vector.broadcast %18 : vector<1x1x1xf32> to vector<1x4x128xf32>
    %20 = arith.mulf %8, %19 : vector<1x4x128xf32>
    %21 = vector.shape_cast %0 : vector<4x128xf32> to vector<1x4x128xf32>
    %22 = arith.mulf %20, %21 : vector<1x4x128xf32>
    %23 = vector.shape_cast %1 : vector<4x128xf32> to vector<1x4x128xf32>
    %24 = arith.addf %22, %23 : vector<1x4x128xf32>
    %c0_11 = arith.constant 0 : index
    %c0_12 = arith.constant 0 : index
    %c0_13 = arith.constant 0 : index
    %25 = vector.load %arg4[%c0_11, %c0_12, %c0_13] : memref<1x4x128xf32, #tpu.memory_space<vmem>>, vector<1x4x128xf32>
    tpu.vector_store %arg4[%c0_11, %c0_12, %c0_13], %24 {strides = array<i32>} : memref<1x4x128xf32, #tpu.memory_space<vmem>>, vector<1x4x128xf32>,
    return
  }
  func.func @transform_0(%arg0: i32) -> (i32, i32, i32) {
    %c0_i32 = arith.constant 0 : i32
    %c0_i32_0 = arith.constant 0 : i32
    %c0_i32_1 = arith.constant 0 : i32
    return %arg0, %c0_i32, %c0_i32_0 : i32, i32, i32
  }
  func.func @transform_1(%arg0: i32) -> (i32, i32) {
    %c0_i32 = arith.constant 0 : i32
    %c0_i32_0 = arith.constant 0 : i32
    %c0_i32_1 = arith.constant 0 : i32
    return %c0_i32, %c0_i32_0 : i32, i32
  }
  func.func @transform_2(%arg0: i32) -> (i32, i32) {
    %c0_i32 = arith.constant 0 : i32
    %c0_i32_0 = arith.constant 0 : i32
    %c0_i32_1 = arith.constant 0 : i32
    return %c0_i32, %c0_i32_0 : i32, i32
  }
  func.func @transform_3(%arg0: i32) -> (i32, i32, i32) {
    %c0_i32 = arith.constant 0 : i32
    %c0_i32_0 = arith.constant 0 : i32
    %c0_i32_1 = arith.constant 0 : i32
    return %arg0, %c0_i32, %c0_i32_0 : i32, i32, i32
  }
}

</mosaic_0001>

<bundles_post_ra>
// kernel: tpu_custom_call.1
= control target key start
LH: loop header
LB: loop body
LE: loop exit
PB: predicated region body
PF: predicated region fallthrough
CT: control target
= control target key end

     0   :  { %8 = vsyncpa [#allocation3], 0  ;;  %s760_s0 = inlined_call_operand.hbm [shape: f32[2,4,128], index: 0, kind: input, shape index: {}]   ;;  %s761_s1 = inlined_call_operand.hbm [shape: f32[4,128], index: 1, kind: input, shape index: {}]   ;;  %s762_s2 = inlined_call_operand.vmem [shape: f32[4,128], index: 2, kind: input, shape index: {}]   ;;  %s763_s3 = inlined_call_operand.hbm [shape: f32[2,4,128], index: 3, kind: output, shape index: {}]  }
   0x1   :  { %10 = vsyncpa [#allocation3 + $0x1], 0 }
   0x2   :  { %11 = vsyncpa [#allocation6], 0 }
   0x3   :  { %12 = vsyncpa [#allocation4], 0 }
   0x4   :  { %14 = vsyncpa [#allocation4 + $0x1], 0  ;;  %s552_s12 = smov 0   ;;  %s554_s13 = smov 0  }
   0x5   :  { %s556_s14 = smov 0   ;;  %s558_s15 = smov 0  }
   0x6 LB: > { %s573_s16 = sadd.s32 4294967295, %s527_s15   ;;  %s326_s17 = sadd.s32 4294967294, %s527_s15   ;;  %s527_s15 = sphi %s558_s15, %s787_s15   ;;  %s523_s14 = sphi %s556_s14, %s786_s14   ;;  %s519_s13 = sphi %s554_s13, %s785_s13   ;;  %s515_s12 = sphi %s552_s12, %s784_s12  }
   0x7   : > { %p40_p0 = scmp.ne.s32.totalorder %s519_s13, %s515_s12  ;;  %p764_p1 = scmp.eq.s32.totalorder %s573_s16, 0 }
   0x8   : > { %p112_p3 = scmp.eq.s32.totalorder %s326_s17, 1  ;;  %p327_p5 = scmp.ge.s32.totalorder %s527_s15, 1 }
   0x9   : > { %p582_p4 = por %p764_p1, %p40_p0  ;;  %p119_p7 = scmp.lt.s32.totalorder %s527_s15, 3 }
   0xa   : > { %p587_p6 = por %p112_p3, %p40_p0  ;;  %s529_s21 = smov [#allocation5]  }
   0xb   : > { %s767_s18 = scalar_select %p582_p4, 1, 0 }
   0xc   : > { %s768_s19 = scalar_select %p587_p6, 1, 0 }
   0xd   : > { %p592_p8 = pnand %p327_p5, %p119_p7  ;;  %s132_s22 = sshll.u32 %s529_s21, 4  ;;  %s133_s22 = int_to_ptr.vmem [resolvable:$true] %s132_s22 }
   0xe   : > { %s600_s23 = sadd.s32 1, %s527_s15   ;;  %s27_s27 = sadd.s32 1, %s523_s14 }
   0xf   : > { %s769_s20 = scalar_select %p592_p8, 1, 0 }
  0x10   : > { %p348_p10 = pneg %p592_p8  ;;  %s24_s25 = ssub.s32 %s527_s15, %s600_s23 }
  0x11   : > { %p610_p12 = scmp.eq.s32.totalorder %s24_s25, 0  ;;  %s399_s30 = scalar_lea.hbm %s761_s1, 64 }
  0x12   : > { %p604_p11 = pnand %p348_p10, %p764_p1  ;;  %p400_p0 = scmp.ne.s32.totalorder %s761_s1, %s399_s30 }
  0x13   : > { %s771_s26 = scalar_select %p610_p12, 1, 0 }
  0x14   : > { %p401_p3 = pneg %p604_p11  ;;  %p406_p10 = scmp.lt.u32.totalorder %s399_s30, %s761_s1 }
  0x16   : > { %p402_p5 = pnand %p401_p3, %p400_p0 }
  0x18   : > { %p403_p7 = pneg %p402_p5 }
  0x1a   : > { %p408_p9 = pnand %p406_p10, %p403_p7 }
  0x1c   : > { %411 = shalt.err (!%p408_p9)
}
  0x1d   : > { %s412_s8 = scalar_lea.vmem %s133_s22, 64  ;;  %p420_p6 = scmp.lt.s32.totalorder %s133_s22, %s133_s22 }
  0x1e   : > { %p413_p1 = scmp.ne.s32.totalorder %s133_s22, %s412_s8  ;;  %p421_p4 = scmp.lt.s32.totalorder %s412_s8, %s412_s8 }
  0x20   : > { %p415_p2 = pnand %p413_p1, %p401_p3  ;;  %p422_p8 = por %p421_p4, %p420_p6 }
  0x22   : > { %p416_p13 = pneg %p415_p2 }
  0x24   : > { %p423_p12 = pnand %p422_p8, %p416_p13 }
  0x26   : > { %426 = shalt.err (!%p423_p12)
}
  0x27   : > { %351 = dma.hbm_to_vmem [thread:$0]  (!%p604_p11), %s761_s1, 64, %s133_s22, [#allocation6]  }
  0x28   : > { %p772_p1 = scmp.ne.s32.totalorder %s771_s26, 0  ;;  %p35_p2 = scmp.eq.s32.totalorder %s527_s15, 0 }
  0x29   : > { %p773_p4 = scmp.ne.s32.totalorder %s523_s14, %s519_s13  ;;  %p774_p6 = scmp.eq.s32.totalorder %s573_s16, 1 }
  0x2a   : > { %s636_s11 = scalar_select %p772_p1, %s523_s14, %s27_s27  }
  0x2b   : > { %p644_p8 = por %p774_p6, %p773_p4  ;;  %p361_p9 = scmp.lt.s32.totalorder %s527_s15, 2 }
  0x2c   : > { %s146_s21 = sand.u32 1, %s523_s14   ;;  %p776_p12 = pmov %p773_p4 }
  0x2d   : > { %s330_s24 = sshll.u32 %s146_s21, 2  ;;  %s331_s25 = sshll.u32 %s527_s15, 6 }
  0x2e   : > { %p36_p13 = por %p35_p2, %p776_p12  ;;  %s657_s22 = scalar_lea.hbm %s760_s0, %s331_s25 }
  0x2f   : > { %s150_s26 = scalar_lea.vmem [#allocation2], %s330_s24  ;;  %s147_s4 = scalar_lea.sflag [#allocation3], %s146_s21 }
  0x30   : > { %s157_s27 = sshll.u32 %s150_s26, 4  ;;  %p659_p11 = pnand %p361_p9, %p36_p13  ;;  %s663_s27 = int_to_ptr.vmem [resolvable:$true] %s157_s27 }
  0x31   : > { %s427_s5 = scalar_lea.hbm %s657_s22, 64  ;;  %s432_s8 = scalar_lea.hbm %s760_s0, 128 }
  0x32   : > { %p428_p0 = scmp.ne.s32.totalorder %s657_s22, %s427_s5  ;;  %p429_p3 = pneg %p659_p11 }
  0x33   : > { %p433_p10 = scmp.lt.u32.totalorder %s657_s22, %s760_s0  ;;  %p434_p1 = scmp.lt.u32.totalorder %s432_s8, %s427_s5 }
  0x34   : > { %p430_p5 = pnand %p429_p3, %p428_p0  ;;  %p436_p4 = scmp.lt.u32.totalorder %s427_s5, %s657_s22 }
  0x35   : > { %p435_p2 = por %p434_p1, %p433_p10 }
  0x36   : > { %p431_p7 = pneg %p430_p5 }
  0x37   : > { %p437_p6 = por %p436_p4, %p435_p2 }
  0x39   : > { %p438_p9 = pnand %p437_p6, %p431_p7 }
  0x3b   : > { %441 = shalt.err (!%p438_p9)
}
  0x3c   : > { %s442_s21 = scalar_lea.vmem %s663_s27, 64  ;;  %s530_s24 = smov [#allocation2]  }
  0x3d   : > { %p443_p12 = scmp.ne.s32.totalorder %s663_s27, %s442_s21  ;;  %s447_s25 = sshll.u32 %s530_s24, 4  ;;  %s448_s25 = int_to_ptr.vmem [resolvable:$false] %s447_s25 }
  0x3e   : > { %s449_s28 = scalar_lea.vmem %s448_s25, 128  ;;  %p450_p5 = scmp.lt.s32.totalorder %s663_s27, %s448_s25 }
  0x3f   : > { %p445_p13 = pnand %p443_p12, %p429_p3  ;;  %p451_p10 = scmp.lt.s32.totalorder %s449_s28, %s442_s21 }
  0x41   : > { %p446_p0 = pneg %p445_p13  ;;  %p452_p1 = por %p451_p10, %p450_p5 }
  0x43   : > { %p453_p2 = pnand %p452_p1, %p446_p0 }
  0x45   : > { %456 = shalt.err (!%p453_p2)
}
  0x46   : > { %355 = dma.hbm_to_vmem [thread:$0]  (!%p659_p11), %s657_s22, 64, %s663_s27, %s147_s4  }
  0x47   : > { %p778_p7 = scmp.ne.s32.totalorder %s769_s20, 0 }
  0x48   : > { %s693_s29 = sand.u32 (!%p778_p7), 1, %s519_s13   ;;  %p779_p3 = scmp.ne.s32.totalorder (!%p778_p7), %s767_s18, 0 }
  0x49   : > { %166 = sbr.rel (%p778_p7) target bundleno = 438 (0x1b6), region = 32  ;;  %s333_s26 = sshll.u32 (!%p778_p7), %s693_s29, 2 }
  0x4a   : > { %s169_s5 = scalar_lea.sflag (!%p778_p7), [#allocation3], %s693_s29  ;;  %s172_s6 = scalar_lea.vmem (!%p778_p7), [#allocation2], %s333_s26 }
  0x50   : > { %502 = dma.done.wait (%p779_p3), %s169_s5, 64  }
  0x51   : > { %504 = vsyncadd (%p779_p3), %s169_s5, 4294967232  ;;  %p780_p11 = scmp.eq.s32.totalorder %s573_s16, 0 }
  0x53   : > { %506 = dma.done.wait (%p780_p11), [#allocation6], 64   ;;  %p781_p4 = pmov %p780_p11 }
  0x54   : > { %vm202_vm0 = vcmask 1043456   ;;  %v201_v0 = vld [vmem:[%s172_s6] sm:$0xf]  ;;  %v199_v24 = vld [vmem:[#allocation5] sm:$0xf]  ;;  %s337_s22 = sshll.u32 %s573_s16, 6 }
  0x55   : > { %508 = vsyncadd (%p781_p4), [#allocation6], 4294967232  ;;  %v203_v1 = vsel %vm202_vm0, %v201_v0, 0.0  ;;  %v200_v26 = vld [vmem:[%s762_s2] sm:$0xf]  ;;  %s198_s27 = scalar_lea.vmem [#allocation7], %s333_s26  ;;  %s716_s8 = scalar_lea.hbm %s763_s3, %s337_s22 }
  0x56   : > { %204 = vadd.xlane.f32.xlu0 %v203_v1  ;;  %s246_s30 = sshll.u32 %s198_s27, 4  ;;  %s233_s9 = scalar_lea.sflag [#allocation4], %s693_s29  ;;  %s718_s30 = int_to_ptr.vmem [resolvable:$true] %s246_s30 }
  0x57   : > { %s457_s10 = scalar_lea.vmem %s718_s30, 64  ;;  %s531_s16 = smov [#allocation7]  }
  0x58   : > { %p458_p6 = scmp.ne.s32.totalorder %s718_s30, %s457_s10  ;;  %s461_s21 = sshll.u32 %s531_s16, 4  ;;  %s462_s21 = int_to_ptr.vmem [resolvable:$false] %s461_s21 }
  0x59   : > { %s463_s24 = scalar_lea.vmem %s462_s21, 128  ;;  %p464_p13 = scmp.lt.s32.totalorder %s718_s30, %s462_s21 }
  0x5a   : > { %p459_p9 = pnand %p458_p6, %p644_p8  ;;  %p465_p0 = scmp.lt.s32.totalorder %s463_s24, %s457_s10 }
  0x5c   : > { %p460_p12 = pneg %p459_p9  ;;  %p466_p5 = por %p465_p0, %p464_p13 }
  0x5e   : > { %p467_p10 = pnand %p466_p5, %p460_p12 }
  0xe3   : > { %v205_v2 = vpop.xlane.xlu0 %204 }
  0xe4   : > { %v206_v3 = vrot.slane %v205_v2, 4 }
  0xe6   : > { %v207_v4 = vadd.f32 %v206_v3, %v205_v2 }
  0xe8   : > { %v208_v5 = vrot.slane %v207_v4, 2 }
  0xea   : > { %v209_v6 = vadd.f32 %v208_v5, %v207_v4 }
  0xec   : > { %v210_v7 = vrot.slane %v209_v6, 1 }
  0xee   : > { %v211_v8 = vadd.f32 %v210_v7, %v209_v6 }
  0xf0   : > { %v212_v9 = vmul.f32 0.001953125, %v211_v8 }
  0xf2   : > { %v213_v10 = vsub.f32 %v201_v0, %v212_v9 }
  0xf4   : > { %v214_v11 = vmul.f32 %v213_v10, %v213_v10 }
  0xf6   : > { %v215_v12 = vsel %vm202_vm0, %v214_v11, 0.0 }
  0xf7   : > { %216 = vadd.xlane.f32.xlu0 %v215_v12 }
 0x184   : > { %v217_v13 = vpop.xlane.xlu0 %216 }
 0x185   : > { %v218_v14 = vrot.slane %v217_v13, 4 }
 0x187   : > { %v219_v15 = vadd.f32 %v218_v14, %v217_v13 }
 0x189   : > { %v220_v16 = vrot.slane %v219_v15, 2 }
 0x18b   : > { %v221_v17 = vadd.f32 %v220_v16, %v219_v15 }
 0x18d   : > { %v222_v18 = vrot.slane %v221_v17, 1 }
 0x18f   : > { %v223_v19 = vadd.f32 %v222_v18, %v221_v17 }
 0x191   : > { %v224_v20 = vmul.f32 0.001953125, %v223_v19 }
 0x193   : > { %v225_v21 = vmax.f32 %v224_v20, 0.0 }
 0x195   : > { %v226_v22 = vadd.f32 1e-05, %v225_v21 }
 0x197   : > { %397 = vrsqrt.f32 %v226_v22 }
 0x1a1   : > { %v398_v23 = vpop.eup %397 }
 0x1a2   : > { %v228_v25 = vmul.f32 %v398_v23, %v213_v10 }
 0x1a4   : > { %v229_v27 = vmul.f32 %v228_v25, %v199_v24 }
 0x1a6   : > { %v230_v28 = vadd.f32 %v229_v27, %v200_v26 }
 0x1a8   : > { %231 = vst [vmem:[%s198_s27] sm:$0xf] %v230_v28 }
 0x1a9   : > { %470 = shalt.err (!%p467_p10)
}
 0x1aa   : > { %s471_s25 = scalar_lea.hbm %s716_s8, 64  ;;  %s475_s26 = scalar_lea.hbm %s763_s3, 128 }
 0x1ab   : > { %p472_p1 = scmp.ne.s32.totalorder %s716_s8, %s471_s25  ;;  %p476_p3 = scmp.lt.u32.totalorder %s716_s8, %s763_s3 }
 0x1ac   : > { %p477_p11 = scmp.lt.u32.totalorder %s475_s26, %s471_s25  ;;  %p479_p6 = scmp.lt.u32.totalorder %s471_s25, %s716_s8 }
 0x1ad   : > { %p473_p2 = pnand %p472_p1, %p644_p8 }
 0x1ae   : > { %p478_p4 = por %p477_p11, %p476_p3 }
 0x1af   : > { %p474_p7 = pneg %p473_p2 }
 0x1b0   : > { %p480_p9 = por %p479_p6, %p478_p4 }
 0x1b2   : > { %p481_p12 = pnand %p480_p9, %p474_p7 }
 0x1b4   : > { %484 = shalt.err (!%p481_p12)
}
 0x1b5   : > { %346 = dma.vmem_to_hbm [thread:$0]  (%p644_p8), %s718_s30, 64, %s716_s8, %s233_s9  }
 0x1b6 PF: > { %s258_s18 = sand.u32 1, %s515_s12   ;;  %p782_p13 = scmp.ne.s32.totalorder %s768_s19, 0 }
 0x1b7   : > { %p783_p0 = scmp.ge.s32.totalorder %s527_s15, 2  ;;  %s259_s20 = scalar_lea.sflag [#allocation4], %s258_s18 }
 0x1b9   : > { %p357_p5 = pnand %p783_p0, %p782_p13 }
 0x1bb   : > { %510 = dma.done.wait (!%p357_p5), %s259_s20, 64  }
 0x1bc   : > { %512 = vsyncadd (!%p357_p5), %s259_s20, 4294967232  ;;  %p17_p10 = scmp.ge.s32.totalorder %s600_s23, 4   ;;  %s784_s12 = smov %s519_s13 }
 0x1bd   : > { %s785_s13 = smov %s523_s14  ;;  %s786_s14 = smov %s636_s11 }
 0x1be   : > { %s787_s15 = smov %s600_s23  ;;  %19 = sbr.rel (!%p17_p10) target bundleno = 6 (0x6), region = 81 }
 0x1c5   :  { %264 = vsyncpa [#allocation3], 1 }
 0x1c6   :  { %266 = vsyncpa [#allocation3 + $0x1], 1 }
 0x1c7   :  { %267 = vsyncpa [#allocation6], 1 }
 0x1c8   :  { %268 = vsyncpa [#allocation4], 1 }
 0x1c9   :  { %270 = vsyncpa [#allocation4 + $0x1], 1 }

</bundles_post_ra>
